<compile_context>
chip_gen: v7x
topology: tpu7x:2x2x1
jax: 0.10.0
libtpu: 0.0.40
codegen_flags: <defaults>
</compile_context>

<pallas_src>
import numpy as np
import jax
import jax.numpy as jnp
from jax import lax
from jax.experimental import pallas as pl
from jax.experimental.pallas import tpu as pltpu

_VMEM_LIMIT_BYTES = 28 * 1024 * 1024      # > v5e 16 MiB default, <= v6e/v7x 32 MiB default
_VMEM_WORKSET_BUDGET = 16 * 1024 * 1024   # double-buffered blocks + scratch target
_TARGET_IN_BYTES_PER_STEP = 2 * 1024 * 1024


# ---------------------------------------------------------------------------
# Host-side (numpy) construction of the folded blur matrices
# ---------------------------------------------------------------------------

def _binomial_coeffs(filt_size: int) -> np.ndarray:
    # np.poly1d((0.5, 0.5)) ** (filt_size - 1) coefficients
    c = np.array([1.0], dtype=np.float64)
    for _ in range(filt_size - 1):
        c = np.convolve(c, np.array([0.5, 0.5], dtype=np.float64))
    return c


def _reflect_index(p: int, pad: int, n: int) -> int:
    # Reflection WITHOUT edge repeat (nn.ReflectionPad2d / jnp.pad mode="reflect").
    q = p - pad
    if q < 0:
        q = -q
    if q >= n:
        q = 2 * (n - 1) - q
    return q


def _fold_matrix(n: int, filt_size: int, stride: int, pad: int) -> np.ndarray:
    """(n_out, n) matrix folding reflection pad + 1D binomial blur + stride decimation."""
    coeffs = _binomial_coeffs(filt_size)
    n_pad = n + 2 * pad
    n_full = n_pad - filt_size + 1                 # stride-1 valid conv length
    n_out = (n_pad - filt_size) // stride + 1
    refl = np.zeros((n_pad, n), np.float64)        # reflection pad selector
    for p in range(n_pad):
        refl[p, _reflect_index(p, pad, n)] = 1.0
    toep = np.zeros((n_full, n_pad), np.float64)   # stride-1 blur (Toeplitz)
    for i in range(n_full):
        toep[i, i:i + filt_size] = coeffs
    sel = np.zeros((n_out, n_full), np.float64)    # stride decimation
    sel[np.arange(n_out), np.arange(n_out) * stride] = 1.0
    return sel @ toep @ refl                       # (n_out, n)


# ---------------------------------------------------------------------------
# Block sizing
# ---------------------------------------------------------------------------

def _choose_plane_batch(nc, in_bytes, work_bytes, fixed_bytes, require_mult8,
                        target_in_bytes=_TARGET_IN_BYTES_PER_STEP,
                        vmem_budget=_VMEM_WORKSET_BUDGET):
    """Planes per grid step.

    Targets ~1-4 MiB of input per step (amortizes the ~0.35 us per-step
    overhead, long DMAs), keeps the double-buffered working set under the VMEM
    budget, and keeps >= 8 grid steps when there are enough planes so both v7x
    TensorCores get several pipelined iterations each.
    """
    avail = max(vmem_budget - fixed_bytes, work_bytes)
    cap = min(avail // work_bytes, max(1, target_in_bytes // max(in_bytes, 1)))
    cap = int(max(1, min(cap, nc)))
    if nc >= 16:
        cap = min(cap, max(1, nc // 8))            # >= 8 grid steps
    best = None
    for tb in range(cap, 0, -1):
        if nc % tb:
            continue
        if best is None:
            best = tb
        # For 2-D blocks the second-minor dim must be a multiple of 8 or the
        # full array extent (the (8,128) BlockSpec rule).
        if not require_mult8 or tb % 8 == 0 or tb == nc:
            return tb
    if require_mult8 and nc * work_bytes + fixed_bytes <= 2 * vmem_budget:
        return nc                                   # one full-extent step
    return best if best is not None else nc


# ---------------------------------------------------------------------------
# In-kernel helpers
# ---------------------------------------------------------------------------

def _split_hi_lo(v):
    """Split an f32 value into (hi, lo) bf16 with hi + lo ~ v (~16-bit mantissa).

    The folded blur matrices are exact in bf16, so two DEFAULT-precision bf16
    MXU passes reproduce the f32 result to ~1e-5 relative accuracy at 1/3 the
    MXU passes of Precision.HIGHEST.
    """
    v32 = v.astype(jnp.float32)
    hi = v32.astype(jnp.bfloat16)
    lo = (v32 - hi.astype(jnp.float32)).astype(jnp.bfloat16)
    return hi, lo


# ---------------------------------------------------------------------------
# Path A: small planes -> single fused, fully lane-dense matmul per block
# ---------------------------------------------------------------------------

def _blur_pool_fused(x, fh, fw, NC, H, W, Ho, Wo, needs_split):
    in_item = jnp.dtype(x.dtype).itemsize
    # out[p, i*Wo+j] = sum_{h,w} x[p, h*W+w] * fh[i,h] * fw[w,j]
    mk = jnp.asarray(np.kron(fh.T, fw), dtype=jnp.bfloat16)      # (H*W, Ho*Wo), exact for filt<=5
    kron_bytes = int(mk.size) * 2

    work = 2 * H * W * in_item + 2 * Ho * Wo * in_item + 2 * H * W * in_item  # dbuf in/out + split temps
    fixed = 2 * kron_bytes + (1 << 20)
    tb = _choose_plane_batch(NC, H * W * in_item, work, fixed, require_mult8=True)
    grid = (NC // tb,)
    passes = 2 if needs_split else 1

    def kernel(x_ref, m_ref, o_ref):
        xv = x_ref[...]                                          # (tb, H*W), lane-dense
        m = m_ref[...]                                           # (H*W, Ho*Wo), resident
        if needs_split:
            hi, lo = _split_hi_lo(xv)
            acc = (jnp.dot(hi, m, preferred_element_type=jnp.float32)
                   + jnp.dot(lo, m, preferred_element_type=jnp.float32))
        else:
            acc = jnp.dot(xv, m, preferred_element_type=jnp.float32)
        o_ref[...] = acc.astype(o_ref.dtype)                     # (tb, Ho*Wo), lane-dense store

    cost = pl.CostEstimate(
        flops=int(2 * NC * (H * W) * (Ho * Wo) * passes),
        transcendentals=0,
        bytes_accessed=int(NC * H * W * in_item + NC * Ho * Wo * in_item + kron_bytes),
    )

    out = pl.pallas_call(
        kernel,
        out_shape=jax.ShapeDtypeStruct((NC, Ho * Wo), x.dtype),
        grid=grid,
        in_specs=[
            pl.BlockSpec((tb, H * W), lambda i: (i, 0)),
            pl.BlockSpec((H * W, Ho * Wo), lambda i: (0, 0)),
        ],
        out_specs=pl.BlockSpec((tb, Ho * Wo), lambda i: (i, 0)),
        compiler_params=pltpu.CompilerParams(
            dimension_semantics=("parallel",),
            vmem_limit_bytes=_VMEM_LIMIT_BYTES),
        cost_estimate=cost,
    )(x.reshape(NC, H * W), mk)
    return out                                                    # (NC, Ho*Wo)


# ---------------------------------------------------------------------------
# Path B: large planes -> batched W-blur matmul + per-plane H-blur (fori_loop)
# ---------------------------------------------------------------------------

def _blur_pool_two_matmul(x, fh, fw, NC, H, W, Ho, Wo, needs_split):
    in_item = jnp.dtype(x.dtype).itemsize
    bh = jnp.asarray(fh, dtype=jnp.bfloat16)                     # (Ho, H), exact dyadic entries
    bw = jnp.asarray(fw, dtype=jnp.bfloat16)                     # (W, Wo), exact dyadic entries
    n_scr = 2 if needs_split else 1
    passes = 2 if needs_split else 1

    work = (2 * H * W * in_item + 2 * Ho * Wo * in_item          # double-buffered in/out blocks
            + n_scr * H * Wo * 2                                 # bf16 intermediate scratch
            + 2 * H * W * in_item)                               # split temporaries / f32 matmul acc
    fixed = 2 * (int(bh.size) + int(bw.size)) * 2 + (1 << 20)
    tb = _choose_plane_batch(NC, H * W * in_item, work, fixed, require_mult8=False)
    grid = (NC // tb,)

    def kernel(x_ref, bw_ref, bh_ref, o_ref, *t_refs):
        # --- W blur: ONE batched MXU matmul over all tb planes (M = tb*H) ---
        # (tb, H, W) -> (tb*H, W) is layout-free when H % 8 == 0 (path selection
        # routes H % 8 != 0 shapes to the fused path whenever feasible).
        xb = x_ref[...].reshape(tb * H, W)
        bwv = bw_ref[...]
        if needs_split:
            hi, lo = _split_hi_lo(xb)
            t = (jnp.dot(hi, bwv, preferred_element_type=jnp.float32)
                 + jnp.dot(lo, bwv, preferred_element_type=jnp.float32))
            th, tl = _split_hi_lo(t)
            t_refs[0][...] = th.reshape(tb, H, Wo)
            t_refs[1][...] = tl.reshape(tb, H, Wo)
        else:
            t = jnp.dot(xb, bwv, preferred_element_type=jnp.float32)
            t_refs[0][...] = t.astype(jnp.bfloat16).reshape(tb, H, Wo)

        # --- H blur: small per-plane matmuls from VMEM scratch (no static
        # tb-wide unroll -> bounded live ranges / no vreg spills) ---
        bhv = bh_ref[...]
        def body(p, carry):
            if needs_split:
                o = (jnp.dot(bhv, t_refs[0][p], preferred_element_type=jnp.float32)
                     + jnp.dot(bhv, t_refs[1][p], preferred_element_type=jnp.float32))
            else:
                o = jnp.dot(bhv, t_refs[0][p], preferred_element_type=jnp.float32)
            o_ref[p] = o.astype(o_ref.dtype)
            return carry
        lax.fori_loop(0, tb, body, 0, unroll=min(4, tb))

    cost = pl.CostEstimate(
        flops=int(2 * NC * (H * W * Wo + Ho * H * Wo) * passes),
        transcendentals=0,
        bytes_accessed=int(NC * H * W * in_item + NC * Ho * Wo * in_item
                           + (int(bh.size) + int(bw.size)) * 2),
    )

    out = pl.pallas_call(
        kernel,
        out_shape=jax.ShapeDtypeStruct((NC, Ho, Wo), x.dtype),
        grid=grid,
        in_specs=[
            pl.BlockSpec((tb, H, W), lambda i: (i, 0, 0)),       # tb planes per step
            pl.BlockSpec((W, Wo), lambda i: (0, 0)),             # folded W matrix (tiny, resident)
            pl.BlockSpec((Ho, H), lambda i: (0, 0)),             # folded H matrix (tiny, resident)
        ],
        out_specs=pl.BlockSpec((tb, Ho, Wo), lambda i: (i, 0, 0)),
        scratch_shapes=[pltpu.VMEM((tb, H, Wo), jnp.bfloat16)] * n_scr,
        compiler_params=pltpu.CompilerParams(
            dimension_semantics=("parallel",),
            vmem_limit_bytes=_VMEM_LIMIT_BYTES),
        cost_estimate=cost,
    )(x.reshape(NC, H, W), bw, bh)
    return out                                                    # (NC, Ho, Wo)


# ---------------------------------------------------------------------------
# Public entry point
# ---------------------------------------------------------------------------

def blur_pool_2d(x: jax.Array, filt_size: int = 3, stride: int = 2) -> jax.Array:
    """BlurPool2d forward. x: (N, C, H, W). Returns (N, C, Ho, Wo)."""
    assert filt_size > 1
    N, C, H, W = x.shape
    pad = ((stride - 1) + (filt_size - 1)) // 2    # timm get_padding(filt, stride, 1)
    assert H > pad and W > pad, "ReflectionPad2d requires spatial dims > pad"
    Ho = (H + 2 * pad - filt_size) // stride + 1
    Wo = (W + 2 * pad - filt_size) // stride + 1
    NC = N * C

    # f32 (and other non-bf16 float) inputs use the 2x bf16 hi/lo-split MXU
    # path (DEFAULT precision only); bf16 inputs run native single-pass bf16.
    needs_split = x.dtype != jnp.bfloat16

    fh = _fold_matrix(H, filt_size, stride, pad)       # (Ho, H)
    fw = _fold_matrix(W, filt_size, stride, pad).T     # (W, Wo)

    kron_bytes = (H * W) * (Ho * Wo) * 2
    # Fused single-matmul path: stays HBM-bound for small planes on all of
    # v5e/v6e/v7x; also used (if the fused matrix is modest) for mid-size planes
    # whose H is not a multiple of 8, where the batched-reshape path is awkward.
    use_fused = filt_size <= 5 and (
        H * W <= 1024 or (H % 8 != 0 and 2 * kron_bytes <= 12 * 1024 * 1024))

    if use_fused:
        out = _blur_pool_fused(x, fh, fw, NC, H, W, Ho, Wo, needs_split)
    else:
        out = _blur_pool_two_matmul(x, fh, fw, NC, H, W, Ho, Wo, needs_split)
    return out.reshape(N, C, Ho, Wo)


# ---------------------------------------------------------------------------
# Pure-JAX reference (mirrors F.conv2d(ReflectionPad2d(x), filt, stride, groups=C))
# ---------------------------------------------------------------------------

def _reference(x: jax.Array, filt_size: int = 3, stride: int = 2) -> jax.Array:
    N, C, H, W = x.shape
    pad = ((stride - 1) + (filt_size - 1)) // 2
    xp = jnp.pad(x, ((0, 0), (0, 0), (pad, pad), (pad, pad)), mode="reflect")
    coeffs = _binomial_coeffs(filt_size)
    f2d = np.outer(coeffs, coeffs).astype(np.float32)
    w = jnp.asarray(np.tile(f2d[None, None], (C, 1, 1, 1)))   # (C, 1, kh, kw)
    return lax.conv_general_dilated(
        xp.astype(jnp.float32), w, window_strides=(stride, stride), padding="VALID",
        dimension_numbers=("NCHW", "OIHW", "NCHW"), feature_group_count=C,
        precision=lax.Precision.HIGHEST,
    ).astype(x.dtype)


if __name__ == "__main__":
    key = jax.random.PRNGKey(0)
    k1, k2, k3 = jax.random.split(key, 3)

    # 1) Small-plane fused path, f32 (hi/lo split: expected error ~1e-5..1e-4).
    x1 = jax.random.normal(k1, (2, 4, 16, 16), dtype=jnp.float32)
    y1 = jax.block_until_ready(blur_pool_2d(x1, filt_size=3, stride=2))
    r1 = jax.block_until_ready(_reference(x1, filt_size=3, stride=2))
    assert y1.shape == (2, 4, 8, 8), y1.shape
    assert jnp.allclose(y1, r1, rtol=5e-4, atol=5e-4), float(jnp.max(jnp.abs(y1 - r1)))

    # 2) Large-plane batched two-matmul path, f32.
    x2 = jax.random.normal(k2, (1, 16, 40, 40), dtype=jnp.float32)
    y2 = jax.block_until_ready(blur_pool_2d(x2, filt_size=3, stride=2))
    r2 = jax.block_until_ready(_reference(x2, filt_size=3, stride=2))
    assert y2.shape == (1, 16, 20, 20), y2.shape
    assert jnp.allclose(y2, r2, rtol=5e-4, atol=5e-4), float(jnp.max(jnp.abs(y2 - r2)))

    # 3) bf16 path (native single-pass bf16 MXU operands end to end).
    x3 = jax.random.normal(k3, (2, 4, 16, 16), dtype=jnp.bfloat16)
    y3 = jax.block_until_ready(blur_pool_2d(x3, filt_size=3, stride=2))
    r3 = jax.block_until_ready(_reference(x3, filt_size=3, stride=2))
    assert jnp.allclose(y3.astype(jnp.float32), r3.astype(jnp.float32),
                        rtol=2e-2, atol=2e-2)

    print("KERNEL_OK")
</pallas_src>

<mosaic_0001>
module attributes {stable_mosaic.version = 11 : i64} {
  func.func @kernel(%arg0: i32, %arg1: memref<8x256xf32, #tpu.memory_space<vmem>>, %arg2: memref<256x64xbf16, #tpu.memory_space<vmem>>, %arg3: memref<8x64xf32, #tpu.memory_space<vmem>>) attributes {dimension_semantics = [#tpu.dimension_semantics<parallel>], iteration_bounds = array<i64: 1>, scalar_prefetch = 0 : i64, scratch_operands = 0 : i64, tpu.core_type = #tpu.core_type<tc>, window_params = [{transform_indices = @transform_0, window_bounds = array<i64: 8, 256>}, {pipeline_mode = #tpu.pipeline_mode<synchronous>, transform_indices = @transform_1, window_bounds = array<i64: 256, 64>}, {transform_indices = @transform_2, window_bounds = array<i64: 8, 64>}]} {
    %c0 = arith.constant 0 : index
    %c0_0 = arith.constant 0 : index
    %0 = vector.load %arg1[%c0, %c0_0] : memref<8x256xf32, #tpu.memory_space<vmem>>, vector<8x256xf32>
    %c0_1 = arith.constant 0 : index
    %c0_2 = arith.constant 0 : index
    %1 = vector.load %arg2[%c0_1, %c0_2] : memref<256x64xbf16, #tpu.memory_space<vmem>>, vector<256x64xbf16>
    %2 = arith.truncf %0 : vector<8x256xf32> to vector<8x256xbf16>
    %3 = arith.extf %2 : vector<8x256xbf16> to vector<8x256xf32>
    %4 = arith.subf %0, %3 : vector<8x256xf32>
    %5 = arith.truncf %4 : vector<8x256xf32> to vector<8x256xbf16>
    %cst = arith.constant dense<0.000000e+00> : vector<8x64xf32>
    %6 = tpu.matmul %2, %1, %cst {dimension_numbers = #tpu.dot_dimension_numbers<[1], [0], [0], [1], [0, 0, 1, 1], [], []>} : vector<8x256xbf16>, vector<256x64xbf16>, vector<8x64xf32> -> vector<8x64xf32>
    %cst_3 = arith.constant dense<0.000000e+00> : vector<8x64xf32>
    %7 = tpu.matmul %5, %1, %cst_3 {dimension_numbers = #tpu.dot_dimension_numbers<[1], [0], [0], [1], [0, 0, 1, 1], [], []>} : vector<8x256xbf16>, vector<256x64xbf16>, vector<8x64xf32> -> vector<8x64xf32>
    %8 = arith.addf %6, %7 : vector<8x64xf32>
    %c0_4 = arith.constant 0 : index
    %c0_5 = arith.constant 0 : index
    %9 = vector.load %arg3[%c0_4, %c0_5] : memref<8x64xf32, #tpu.memory_space<vmem>>, vector<8x64xf32>
    tpu.vector_store %arg3[%c0_4, %c0_5], %8 {strides = array<i32>} : memref<8x64xf32, #tpu.memory_space<vmem>>, vector<8x64xf32>,
    return
  }
  func.func @transform_0(%arg0: i32) -> (i32, i32) {
    %c0_i32 = arith.constant 0 : i32
    %c0_i32_0 = arith.constant 0 : i32
    return %arg0, %c0_i32 : i32, i32
  }
  func.func @transform_1(%arg0: i32) -> (i32, i32) {
    %c0_i32 = arith.constant 0 : i32
    %c0_i32_0 = arith.constant 0 : i32
    %c0_i32_1 = arith.constant 0 : i32
    return %c0_i32, %c0_i32_0 : i32, i32
  }
  func.func @transform_2(%arg0: i32) -> (i32, i32) {
    %c0_i32 = arith.constant 0 : i32
    %c0_i32_0 = arith.constant 0 : i32
    return %arg0, %c0_i32 : i32, i32
  }
}

</mosaic_0001>

<bundles_post_ra>
// kernel: tpu_custom_call.1
= control target key start
LH: loop header
LB: loop body
LE: loop exit
PB: predicated region body
PF: predicated region fallthrough
CT: control target
= control target key end

     0   :  { %s430_s0 = inlined_call_operand.vmem [shape: f32[8,256], index: 0, kind: input, shape index: {}]   ;;  %s431_s1 = inlined_call_operand.vmem [shape: bf16[256,64], index: 1, kind: input, shape index: {}]   ;;  %s432_s2 = inlined_call_operand.hbm [shape: f32[8,64], index: 2, kind: output, shape index: {}]  }
   0x1   :  { %v308_v0 = vld [vmem:[%s431_s1 + $0x40] sm:$0xff]   ;;  %v310_v2 = vld [vmem:[%s431_s1 + $0x48] sm:$0xff]   ;;  %v312_v4 = vld [vmem:[%s431_s1 + $0x50] sm:$0xff]  }
   0x2   :  { %v309_v1 = vld [vmem:[%s431_s1] sm:$0xff]   ;;  %263 = vmatprep.subr.bf16.mxu0 %v308_v0  ;;  %285 = vmatprep.subr.bf16.mxu1 %v308_v0  ;;  %v311_v3 = vld [vmem:[%s431_s1 + $0x8] sm:$0xff]   ;;  %v313_v5 = vld [vmem:[%s431_s1 + $0x10] sm:$0xff]  }
   0x3   :  { %264 = vmatpush3.bf16.msra.mxu0 %v309_v1  ;;  %286 = vmatpush3.bf16.msra.mxu1 %v309_v1  ;;  %v314_v6 = vld [vmem:[%s431_s1 + $0x58] sm:$0xff]   ;;  %v316_v8 = vld [vmem:[%s431_s1 + $0x60] sm:$0xff]   ;;  %v318_v10 = vld [vmem:[%s431_s1 + $0x68] sm:$0xff]  }
   0x4   :  { %265 = vmatprep.subr.bf16.mxu0 %v310_v2  ;;  %287 = vmatprep.subr.bf16.mxu1 %v310_v2  ;;  %v315_v7 = vld [vmem:[%s431_s1 + $0x18] sm:$0xff]   ;;  %v317_v9 = vld [vmem:[%s431_s1 + $0x20] sm:$0xff]   ;;  %v14_v11 = vld [vmem:[%s430_s0 + $0x8] sm:$0xff] }
   0x5   :  { %v13_v12 = vld [vmem:[%s430_s0] sm:$0xff] }
   0x7   :  { %266 = vmatpush3.bf16.msra.mxu0 %v311_v3  ;;  %288 = vmatpush3.bf16.msra.mxu1 %v311_v3 }
   0x8   :  { %267 = vmatprep.subr.bf16.mxu0 %v312_v4  ;;  %289 = vmatprep.subr.bf16.mxu1 %v312_v4 }
   0xb   :  { %268 = vmatpush3.bf16.msra.mxu0 %v313_v5  ;;  %290 = vmatpush3.bf16.msra.mxu1 %v313_v5 }
   0xc   :  { %269 = vmatprep.subr.bf16.mxu0 %v314_v6  ;;  %291 = vmatprep.subr.bf16.mxu1 %v314_v6 }
   0xf   :  { %270 = vmatpush3.bf16.msra.mxu0 %v315_v7  ;;  %292 = vmatpush3.bf16.msra.mxu1 %v315_v7 }
  0x10   :  { %271 = vmatprep.subr.bf16.mxu0 %v316_v8  ;;  %293 = vmatprep.subr.bf16.mxu1 %v316_v8 }
  0x11   :  { %7 = vsyncpa [#allocation3], 0  ;;  %v48_v13 = vpack.c.bf16 %v14_v11, %v14_v11  ;;  %v47_v14 = vpack.c.bf16 %v13_v12, %v13_v12  ;;  %v319_v15 = vld [vmem:[%s431_s1 + $0x28] sm:$0xff]   ;;  %v320_v17 = vld [vmem:[%s431_s1 + $0x70] sm:$0xff]   ;;  %s348_s16 = smov [#allocation2]   ;;  %vm231_vm0 = vcmask 523264  }
  0x12   :  { %v321_v20 = vld [vmem:[%s431_s1 + $0x30] sm:$0xff]   ;;  %v322_v22 = vld [vmem:[%s431_s1 + $0x78] sm:$0xff]   ;;  %s239_s17 = sshll.u32 %s348_s16, 4  ;;  %s240_s17 = int_to_ptr.vmem [resolvable:$true] %s239_s17 }
  0x13   :  { %272 = vmatpush3.bf16.msra.mxu0 %v317_v9  ;;  %294 = vmatpush3.bf16.msra.mxu1 %v317_v9  ;;  %v50_v16 = vunpack.c.l.bf16 %v48_v13  ;;  %v49_v19 = vunpack.c.l.bf16 %v47_v14  ;;  %v323_v24 = vld [vmem:[%s431_s1 + $0x38] sm:$0xff]   ;;  %s324_s1 = scalar_lea.vmem %s240_s17, 128  ;;  %p329_p1 = scmp.lt.s32.totalorder %s240_s17, %s240_s17 }
  0x14   :  { %273 = vmatprep.subr.bf16.mxu0 %v318_v10  ;;  %295 = vmatprep.subr.bf16.mxu1 %v318_v10  ;;  %p325_p0 = scmp.ne.s32.totalorder %s240_s17, %s324_s1  ;;  %p330_p2 = scmp.lt.s32.totalorder %s324_s1, %s324_s1 }
  0x15   :  { %v52_v18 = vsub.f32 %v14_v11, %v50_v16  ;;  %223 = vmatprep.mubr.bf16.mxu1 %v48_v13  ;;  %v51_v23 = vsub.f32 %v13_v12, %v49_v19 }
  0x16   :  { %p331_p3 = por %p330_p2, %p329_p1 }
  0x17   :  { %274 = vmatpush3.bf16.msra.mxu0 %v319_v15  ;;  %296 = vmatpush3.bf16.msra.mxu1 %v319_v15  ;;  %v54_v21 = vpack.c.bf16 %v52_v18, %v52_v18  ;;  %v53_v25 = vpack.c.bf16 %v51_v23, %v51_v23 }
  0x18   :  { %275 = vmatprep.subr.bf16.mxu0 %v320_v17  ;;  %297 = vmatprep.subr.bf16.mxu1 %v320_v17  ;;  %p332_p4 = pnand %p331_p3, %p325_p0 }
  0x19   :  { %183 = vmatprep.mubr.bf16.mxu0 %v54_v21 }
  0x1b   :  { %276 = vmatpush3.bf16.msra.mxu0 %v321_v20  ;;  %298 = vmatpush3.bf16.msra.mxu1 %v321_v20 }
  0x1c   :  { %277 = vmatprep.subr.bf16.mxu0 %v322_v22  ;;  %299 = vmatprep.subr.bf16.mxu1 %v322_v22 }
  0x1f   :  { %278 = vmatpush3.bf16.msra.mxu0 %v323_v24  ;;  %300 = vmatpush3.bf16.msra.mxu1 %v323_v24 }
  0x22   :  { %184 = vmatmul.mubr.bf16.vlgmr.msra.gmra.mrb[0].mxu0 %v53_v25  ;;  %224 = vmatmul.mubr.bf16.vlgmr.msra.gmra.mrb[0].mxu1 %v47_v14 }
  0xf5   :  { %v279_v26 = vpop.f32.mrb[0].mxu0  ;;  %v301_v27 = vpop.f32.mrb[0].mxu1 }
  0xf6   :  { %v280_v28 = vpop.f32.mrb[1].mxu0  ;;  %v302_v29 = vpop.f32.mrb[1].mxu1 }
  0xf7   :  { %v281_v30 = vadd.f32 %v280_v28, %v279_v26  ;;  %v303_v31 = vadd.f32 %v302_v29, %v301_v27  ;;  %v282_v32 = vpop.f32.mrb[2].mxu0  ;;  %v304_v33 = vpop.f32.mrb[2].mxu1 }
  0xf8   :  { %v283_v34 = vpop.f32.mrb[3].mxu0  ;;  %v305_v35 = vpop.f32.mrb[3].mxu1 }
  0xf9   :  { %v226_v36 = vadd.f32 %v303_v31, %v281_v30 }
  0xfb   :  { %232 = vst.msk [vmem:[#allocation2] sm:$0xff] %vm231_vm0, %v226_v36 }
  0xfc   :  { %335 = shalt.err (!%p332_p4)
}
  0xfd   :  { %s336_s20 = scalar_lea.hbm %s432_s2, 128 }
  0xfe   :  { %p337_p5 = scmp.ne.s32.totalorder %s432_s2, %s336_s20  ;;  %p340_p6 = scmp.lt.u32.totalorder %s336_s20, %s432_s2 }
 0x100   :  { %p342_p7 = pnand %p340_p6, %p337_p5 }
 0x102   :  { %345 = shalt.err (!%p342_p7)
}
 0x103   :  { %242 = dma.vmem_to_hbm [thread:$0]  %s240_s17, 128, %s432_s2, [#allocation3]  }
 0x104   :  { %346 = dma.done.wait [#allocation3], 128  }
 0x105   :  { %347 = vsyncadd [#allocation3], 4294967168 }
 0x106   :  { %246 = vsyncpa [#allocation3], 1 }

</bundles_post_ra>
